<compile_context>
chip_gen: v7x
topology: tpu7x:2x2x1
jax: 0.10.0
libtpu: 0.0.40
codegen_flags: <defaults>
</compile_context>

<pallas_src>
import functools

import jax
import jax.numpy as jnp
from jax.experimental import pallas as pl
from jax.experimental.pallas import tpu as pltpu


def layernorm_kernel(x_ref, a_ref, b_ref, o_ref, *, eps: float):
    x = x_ref[...].astype(jnp.float32)                      # (TR, F)
    n = x.shape[-1]
    mean = jnp.mean(x, axis=-1, keepdims=True)              # (TR, 1)
    xc = x - mean
    # torch.std default: unbiased (divide by N-1); eps is added to the std.
    var = jnp.sum(xc * xc, axis=-1, keepdims=True) * (1.0 / (n - 1))
    std = jnp.sqrt(var)
    denom = std + eps                                       # (TR, 1)
    # Per-row reciprocal on the (otherwise idle) EUP slot, refined with one
    # Newton step so numerics stay at f32 precision; the broadcasted multiply
    # over F replaces F per-element divides per row.
    inv = pl.reciprocal(denom, approx=True)
    inv = inv * (2.0 - denom * inv)                         # per-row only, cheap
    a = a_ref[...].astype(jnp.float32)                      # (1, F)
    b = b_ref[...].astype(jnp.float32)                      # (1, F)
    o_ref[...] = ((xc * inv) * a + b).astype(o_ref.dtype)


def _vmem_capacity_bytes() -> int:
    """Physical VMEM per TensorCore (128 MiB v5e/v6e, 64 MiB v7x)."""
    try:
        return int(pltpu.get_tpu_info().vmem_capacity_bytes)
    except Exception:
        return 64 << 20  # conservative fallback (v7x per-TC VMEM)


def _pick_tile_rows(rows: int, features: int, itemsize: int, vmem_bytes: int) -> int:
    # Per grid step the pipeline double-buffers the input and output tiles:
    # ~4 * tile_rows * F * itemsize live bytes. Keep that under ~half of
    # physical VMEM (headroom for a/b, temporaries). This naturally halves the
    # tile on v7x (64 MiB) relative to v5e/v6e (128 MiB).
    budget = vmem_bytes // 2
    per_row_bytes = 4 * features * itemsize
    cap = max(8, budget // max(per_row_bytes, 1))
    cap = min(cap, 1024)            # >=512-row tiles are already ~85%+ of roofline
    cap = (cap // 8) * 8
    # Keep a few grid steps so the DMA pipeline has depth and the "parallel"
    # row axis can shard across both TensorCores on v7x.
    want = ((pl.cdiv(rows, 4) + 7) // 8) * 8
    return max(8, min(cap, want))


def layer_norm(x, a_2, b_2, eps=1e-6, tile_rows=None):
    orig_shape = x.shape
    features = orig_shape[-1]
    x2d = x.reshape(-1, features)                           # (rows, F)
    rows = x2d.shape[0]
    itemsize = jnp.dtype(x.dtype).itemsize

    vmem_cap = _vmem_capacity_bytes()
    if tile_rows is None:
        tile_rows = _pick_tile_rows(rows, features, itemsize, vmem_cap)

    a2d = a_2.reshape(1, features)
    b2d = b_2.reshape(1, features)

    # TODO(synk): for F not a multiple of 128, pad the feature axis to a
    # lane-dense width (with a masked reduction in-kernel); for F in the tens
    # of thousands, split F across an "arbitrary" grid axis with per-row
    # sum / sum-of-squares accumulators instead of shrinking tile_rows.

    grid = (pl.cdiv(rows, tile_rows),)

    # Scoped-VMEM limit sized to the double-buffered tiles (+ a/b + slack).
    needed = 4 * tile_rows * features * itemsize
    needed += 4 * features * jnp.dtype(a_2.dtype).itemsize
    needed += 2 << 20
    vmem_limit = int(min(max(needed, 32 << 20), int(vmem_cap * 0.9)))

    kernel = functools.partial(layernorm_kernel, eps=float(eps))

    out2d = pl.pallas_call(
        kernel,
        out_shape=jax.ShapeDtypeStruct((rows, features), x.dtype),
        grid_spec=pltpu.PrefetchScalarGridSpec(
            num_scalar_prefetch=0,
            grid=grid,
            in_specs=[
                pl.BlockSpec((tile_rows, features), lambda i: (i, 0)),
                pl.BlockSpec((1, features), lambda i: (0, 0)),
                pl.BlockSpec((1, features), lambda i: (0, 0)),
            ],
            out_specs=pl.BlockSpec((tile_rows, features), lambda i: (i, 0)),
        ),
        compiler_params=pltpu.CompilerParams(
            dimension_semantics=("parallel",),
            vmem_limit_bytes=vmem_limit,
        ),
    )(x2d, a2d, b2d)

    return out2d.reshape(orig_shape)


if __name__ == "__main__":
    batch, seq, features = 2, 8, 128
    key = jax.random.PRNGKey(0)
    x = jax.random.normal(key, (batch, seq, features), dtype=jnp.float32)

    # Deterministic parameter init, same as the nn.Module __init__.
    a_2 = jnp.ones((features,), dtype=jnp.float32)
    b_2 = jnp.zeros((features,), dtype=jnp.float32)
    eps = 1e-6

    out = layer_norm(x, a_2, b_2, eps=eps)
    out = jax.block_until_ready(out)

    # Plain-JAX reference (torch.std is unbiased; eps added to std).
    mean = jnp.mean(x, axis=-1, keepdims=True)
    std = jnp.sqrt(jnp.sum((x - mean) ** 2, axis=-1, keepdims=True) / (features - 1))
    ref = a_2 * (x - mean) / (std + eps) + b_2
    # Slightly relaxed tolerance: the EUP approx reciprocal + Newton step is
    # accurate to ~1e-6 relative, well inside 1e-4.
    assert jnp.allclose(out, ref, atol=1e-4, rtol=1e-4), float(
        jnp.max(jnp.abs(out - ref))
    )

    print("KERNEL_OK")
</pallas_src>

<mosaic_0001>
module attributes {stable_mosaic.version = 11 : i64} {
  func.func @layernorm_kernel(%arg0: i32, %arg1: memref<8x128xf32, #tpu.memory_space<vmem>>, %arg2: memref<1x128xf32, #tpu.memory_space<vmem>>, %arg3: memref<1x128xf32, #tpu.memory_space<vmem>>, %arg4: memref<8x128xf32, #tpu.memory_space<vmem>>) attributes {dimension_semantics = [#tpu.dimension_semantics<parallel>], iteration_bounds = array<i64: 2>, scalar_prefetch = 0 : i64, scratch_operands = 0 : i64, tpu.core_type = #tpu.core_type<tc>, window_params = [{transform_indices = @transform_0, window_bounds = array<i64: 8, 128>}, {pipeline_mode = #tpu.pipeline_mode<synchronous>, transform_indices = @transform_1, window_bounds = array<i64: 1, 128>}, {pipeline_mode = #tpu.pipeline_mode<synchronous>, transform_indices = @transform_2, window_bounds = array<i64: 1, 128>}, {transform_indices = @transform_3, window_bounds = array<i64: 8, 128>}]} {
    %c0 = arith.constant 0 : index
    %c0_0 = arith.constant 0 : index
    %0 = vector.load %arg1[%c0, %c0_0] : memref<8x128xf32, #tpu.memory_space<vmem>>, vector<8x128xf32>
    %cst = arith.constant dense<0.000000e+00> : vector<8xf32>
    %1 = vector.multi_reduction <add>, %0, %cst [1] : vector<8x128xf32> to vector<8xf32>
    %2 = vector.shape_cast %1 : vector<8xf32> to vector<8x1xf32>
    %cst_1 = arith.constant 1.280000e+02 : f32
    %3 = vector.broadcast %cst_1 : f32 to vector<8x1xf32>
    %4 = arith.divf %2, %3 : vector<8x1xf32>
    %5 = vector.broadcast %4 : vector<8x1xf32> to vector<8x128xf32>
    %6 = arith.subf %0, %5 : vector<8x128xf32>
    %7 = arith.mulf %6, %6 : vector<8x128xf32>
    %cst_2 = arith.constant dense<0.000000e+00> : vector<8xf32>
    %8 = vector.multi_reduction <add>, %7, %cst_2 [1] : vector<8x128xf32> to vector<8xf32>
    %9 = vector.shape_cast %8 : vector<8xf32> to vector<8x1xf32>
    %cst_3 = arith.constant 0.00787401571 : f32
    %10 = vector.broadcast %cst_3 : f32 to vector<8x1xf32>
    %11 = arith.mulf %9, %10 : vector<8x1xf32>
    %12 = math.sqrt %11 : vector<8x1xf32>
    %cst_4 = arith.constant 9.99999997E-7 : f32
    %13 = vector.broadcast %cst_4 : f32 to vector<8x1xf32>
    %14 = arith.addf %12, %13 : vector<8x1xf32>
    %15 = tpu.reciprocal %14 {approx = true} : vector<8x1xf32> -> vector<8x1xf32>
    %16 = arith.mulf %14, %15 : vector<8x1xf32>
    %cst_5 = arith.constant 2.000000e+00 : f32
    %17 = vector.broadcast %cst_5 : f32 to vector<8x1xf32>
    %18 = arith.subf %17, %16 : vector<8x1xf32>
    %19 = arith.mulf %15, %18 : vector<8x1xf32>
    %c0_6 = arith.constant 0 : index
    %c0_7 = arith.constant 0 : index
    %20 = vector.load %arg2[%c0_6, %c0_7] : memref<1x128xf32, #tpu.memory_space<vmem>>, vector<1x128xf32>
    %c0_8 = arith.constant 0 : index
    %c0_9 = arith.constant 0 : index
    %21 = vector.load %arg3[%c0_8, %c0_9] : memref<1x128xf32, #tpu.memory_space<vmem>>, vector<1x128xf32>
    %22 = vector.broadcast %19 : vector<8x1xf32> to vector<8x128xf32>
    %23 = arith.mulf %6, %22 : vector<8x128xf32>
    %24 = vector.broadcast %20 : vector<1x128xf32> to vector<8x128xf32>
    %25 = arith.mulf %23, %24 : vector<8x128xf32>
    %26 = vector.broadcast %21 : vector<1x128xf32> to vector<8x128xf32>
    %27 = arith.addf %25, %26 : vector<8x128xf32>
    %c0_10 = arith.constant 0 : index
    %c0_11 = arith.constant 0 : index
    %28 = vector.load %arg4[%c0_10, %c0_11] : memref<8x128xf32, #tpu.memory_space<vmem>>, vector<8x128xf32>
    tpu.vector_store %arg4[%c0_10, %c0_11], %27 {strides = array<i32>} : memref<8x128xf32, #tpu.memory_space<vmem>>, vector<8x128xf32>,
    return
  }
  func.func @transform_0(%arg0: i32) -> (i32, i32) {
    %c0_i32 = arith.constant 0 : i32
    %c0_i32_0 = arith.constant 0 : i32
    return %arg0, %c0_i32 : i32, i32
  }
  func.func @transform_1(%arg0: i32) -> (i32, i32) {
    %c0_i32 = arith.constant 0 : i32
    %c0_i32_0 = arith.constant 0 : i32
    %c0_i32_1 = arith.constant 0 : i32
    return %c0_i32, %c0_i32_0 : i32, i32
  }
  func.func @transform_2(%arg0: i32) -> (i32, i32) {
    %c0_i32 = arith.constant 0 : i32
    %c0_i32_0 = arith.constant 0 : i32
    %c0_i32_1 = arith.constant 0 : i32
    return %c0_i32, %c0_i32_0 : i32, i32
  }
  func.func @transform_3(%arg0: i32) -> (i32, i32) {
    %c0_i32 = arith.constant 0 : i32
    %c0_i32_0 = arith.constant 0 : i32
    return %arg0, %c0_i32 : i32, i32
  }
}

</mosaic_0001>

<bundles_post_ra>
// kernel: tpu_custom_call.1
= control target key start
LH: loop header
LB: loop body
LE: loop exit
PB: predicated region body
PF: predicated region fallthrough
CT: control target
= control target key end

     0   :  { %8 = vsyncpa [#allocation3], 0  ;;  %s665_s0 = inlined_call_operand.hbm [shape: f32[16,128], index: 0, kind: input, shape index: {}]   ;;  %s666_s1 = inlined_call_operand.vmem [shape: f32[1,128], index: 1, kind: input, shape index: {}]   ;;  %s667_s2 = inlined_call_operand.vmem [shape: f32[1,128], index: 2, kind: input, shape index: {}]   ;;  %s668_s3 = inlined_call_operand.hbm [shape: f32[16,128], index: 3, kind: output, shape index: {}]  }
   0x1   :  { %10 = vsyncpa [#allocation3 + $0x1], 0 }
   0x2   :  { %11 = vsyncpa [#allocation4], 0 }
   0x3   :  { %13 = vsyncpa [#allocation4 + $0x1], 0  ;;  %s494_s12 = smov 0   ;;  %s496_s13 = smov 0  }
   0x4   :  { %s498_s14 = smov 0   ;;  %s500_s15 = smov 0  }
   0x5 LB: > { %s515_s16 = sadd.s32 4294967295, %s470_s15   ;;  %s310_s17 = sadd.s32 4294967294, %s470_s15   ;;  %s470_s15 = sphi %s500_s15, %s683_s15   ;;  %s466_s14 = sphi %s498_s14, %s682_s14   ;;  %s462_s13 = sphi %s496_s13, %s681_s13   ;;  %s458_s12 = sphi %s494_s12, %s680_s12  }
   0x6   : > { %s519_s18 = sadd.s32 1, %s470_s15   ;;  %s26_s19 = sadd.s32 1, %s466_s14 }
   0x7   : > { %s23_s20 = ssub.s32 %s470_s15, %s519_s18  ;;  %p33_p0 = scmp.ne.s32.totalorder %s466_s14, %s462_s13 }
   0x8   : > { %p24_p1 = scmp.eq.s32.totalorder %s23_s20, 0  ;;  %p34_p2 = scmp.eq.s32.totalorder %s470_s15, 0 }
   0x9   : > { %p39_p3 = scmp.ne.s32.totalorder %s462_s13, %s458_s12  ;;  %p40_p4 = scmp.eq.s32.totalorder %s515_s16, 0 }
   0xa   : > { %s531_s21 = scalar_select %p24_p1, %s466_s14, %s26_s19  }
   0xb   : > { %p533_p5 = por %p34_p2, %p33_p0  ;;  %p537_p6 = por %p40_p4, %p39_p3 }
   0xc   : > { %p105_p7 = scmp.eq.s32.totalorder %s515_s16, 1  ;;  %p111_p8 = scmp.eq.s32.totalorder %s310_s17, 1 }
   0xd   : > { %p336_p10 = scmp.lt.s32.totalorder %s470_s15, 2  ;;  %s137_s26 = sand.u32 1, %s466_s14  }
   0xe   : > { %p544_p11 = por %p105_p7, %p33_p0  ;;  %p548_p12 = por %p111_p8, %p39_p3 }
   0xf   : > { %s314_s27 = sshll.u32 %s470_s15, 7  ;;  %s313_s28 = sshll.u32 %s137_s26, 3 }
  0x10   : > { %s672_s24 = scalar_select %p544_p11, 1, 0 }
  0x11   : > { %s673_s25 = scalar_select %p548_p12, 1, 0 }
  0x12   : > { %s557_s4 = scalar_lea.hbm %s665_s0, %s314_s27  ;;  %s141_s5 = scalar_lea.vmem [#allocation2], %s313_s28 }
  0x13   : > { %s148_s6 = sshll.u32 %s141_s5, 4  ;;  %p561_p13 = pnand %p336_p10, %p533_p5  ;;  %s565_s6 = int_to_ptr.vmem [resolvable:$true] %s148_s6 }
  0x14   : > { %s138_s8 = scalar_lea.sflag [#allocation3], %s137_s26  ;;  %s374_s9 = scalar_lea.hbm %s557_s4, 128 }
  0x15   : > { %p375_p2 = scmp.ne.s32.totalorder %s557_s4, %s374_s9  ;;  %p376_p3 = pneg %p561_p13 }
  0x16   : > { %s379_s17 = scalar_lea.hbm %s665_s0, 256  ;;  %p380_p5 = scmp.lt.u32.totalorder %s557_s4, %s665_s0 }
  0x17   : > { %p377_p4 = pnand %p376_p3, %p375_p2  ;;  %p381_p8 = scmp.lt.u32.totalorder %s379_s17, %s374_s9 }
  0x18   : > { %p383_p9 = scmp.lt.u32.totalorder %s374_s9, %s557_s4 }
  0x19   : > { %p378_p7 = pneg %p377_p4  ;;  %p382_p10 = por %p381_p8, %p380_p5 }
  0x1b   : > { %p384_p0 = por %p383_p9, %p382_p10 }
  0x1d   : > { %p385_p1 = pnand %p384_p0, %p378_p7 }
  0x1f   : > { %388 = shalt.err (!%p385_p1)
}
  0x20   : > { %s389_s22 = scalar_lea.vmem %s565_s6, 128  ;;  %s472_s26 = smov [#allocation2]  }
  0x21   : > { %p390_p2 = scmp.ne.s32.totalorder %s565_s6, %s389_s22  ;;  %s394_s27 = sshll.u32 %s472_s26, 4  ;;  %s395_s27 = int_to_ptr.vmem [resolvable:$false] %s394_s27 }
  0x22   : > { %s396_s28 = scalar_lea.vmem %s395_s27, 256  ;;  %p397_p11 = scmp.lt.s32.totalorder %s565_s6, %s395_s27 }
  0x23   : > { %p392_p4 = pnand %p390_p2, %p376_p3  ;;  %p398_p5 = scmp.lt.s32.totalorder %s396_s28, %s389_s22 }
  0x25   : > { %p393_p12 = pneg %p392_p4  ;;  %p399_p8 = por %p398_p5, %p397_p11 }
  0x27   : > { %p400_p9 = pnand %p399_p8, %p393_p12 }
  0x29   : > { %403 = shalt.err (!%p400_p9)
}
  0x2a   : > { %331 = dma.hbm_to_vmem [thread:$0]  (!%p561_p13), %s557_s4, 128, %s565_s6, %s138_s8  }
  0x2b   : > { %p675_p0 = scmp.lt.s32.totalorder %s470_s15, 3  ;;  %p676_p1 = scmp.ge.s32.totalorder %s470_s15, 1 }
  0x2d   : > { %p154_p3 = pnand %p676_p1, %p675_p0 }
  0x2e   : > { %s599_s29 = sand.u32 (!%p154_p3), 1, %s462_s13  }
  0x2f   : > { %157 = sbr.rel (%p154_p3) target bundleno = 402 (0x192), region = 32  ;;  %s316_s30 = sshll.u32 (!%p154_p3), %s599_s29, 3 }
  0x30   : > { %s160_s5 = scalar_lea.sflag (!%p154_p3), [#allocation3], %s599_s29  ;;  %s163_s7 = scalar_lea.vmem (!%p154_p3), [#allocation2], %s316_s30 }
  0x36   : > { %449 = dma.done.wait (%p537_p6), %s160_s5, 128  }
  0x37   : > { %451 = vsyncadd (%p537_p6), %s160_s5, 4294967168  ;;  %v186_v0 = vld [vmem:[%s163_s7] sm:$0xff]  ;;  %s321_s9 = sshll.u32 %s515_s16, 7  ;;  %s185_s10 = scalar_lea.vmem [#allocation5], %s316_s30 }
  0x38   : > { %187 = vadd.xlane.f32.xlu0 %v186_v0  ;;  %v318_v17 = vld [vmem:[%s666_s1] ss:$0 sm:$0xff]  ;;  %s240_s11 = sshll.u32 %s185_s10, 4  ;;  %s621_s20 = scalar_lea.hbm %s668_s3, %s321_s9  ;;  %s623_s11 = int_to_ptr.vmem [resolvable:$true] %s240_s11 }
  0x39   : > { %v319_v19 = vld [vmem:[%s667_s2] ss:$0 sm:$0xff]  ;;  %s227_s22 = scalar_lea.sflag [#allocation4], %s599_s29  ;;  %s404_s26 = scalar_lea.vmem %s623_s11, 128 }
  0x3a   : > { %p405_p6 = scmp.ne.s32.totalorder %s623_s11, %s404_s26  ;;  %p677_p11 = scmp.ne.s32.totalorder %s672_s24, 0 }
  0x3b   : > { %s473_s16 = smov [#allocation5]  }
  0x3c   : > { %p406_p12 = pnand %p405_p6, %p677_p11  ;;  %s408_s27 = sshll.u32 %s473_s16, 4  ;;  %s409_s27 = int_to_ptr.vmem [resolvable:$false] %s408_s27 }
  0x3d   : > { %s410_s28 = scalar_lea.vmem %s409_s27, 256  ;;  %p411_p7 = scmp.lt.s32.totalorder %s623_s11, %s409_s27 }
  0x3e   : > { %p407_p13 = pneg %p406_p12  ;;  %p412_p10 = scmp.lt.s32.totalorder %s410_s28, %s404_s26 }
  0x40   : > { %p413_p2 = por %p412_p10, %p411_p7 }
  0x42   : > { %p414_p4 = pnand %p413_p2, %p407_p13 }
  0xc5   : > { %v188_v1 = vpop.xlane.xlu0 %187 }
  0xc6   : > { %v190_v2 = vmul.f32 0.0078125, %v188_v1 }
  0xc8   : > { %v191_v3 = vsub.f32 %v186_v0, %v190_v2 }
  0xca   : > { %v192_v4 = vmul.f32 %v191_v3, %v191_v3 }
  0xcc   : > { %193 = vadd.xlane.f32.xlu0 %v192_v4 }
 0x159   : > { %v194_v5 = vpop.xlane.xlu0 %193 }
 0x15a   : > { %v195_v6 = vmul.f32 0.007874016, %v194_v5 }
 0x15c   : > { %370 = vrsqrt.f32 %v195_v6  ;;  %vm198_vm0 = vcmp.eq.f32.partialorder %v195_v6, inf  ;;  %v201_v9 = vand.u32 2147483648, %v195_v6  ;;  %vm200_vm1 = vcmp.eq.f32.partialorder %v195_v6, 0.0 }
 0x166   : > { %v371_v7 = vpop.eup %370 }
 0x167   : > { %v197_v8 = vmul.f32 %v371_v7, %v195_v6 }
 0x169   : > { %v199_v10 = vsel %vm198_vm0, %v195_v6, %v197_v8 }
 0x16a   : > { %v202_v11 = vsel %vm200_vm1, %v201_v9, %v199_v10 }
 0x16b   : > { %v203_v12 = vadd.f32 1e-06, %v202_v11 }
 0x16d   : > { %372 = vrcp.f32 %v203_v12 }
 0x177   : > { %v373_v13 = vpop.eup %372 }
 0x178   : > { %v205_v14 = vmul.f32 %v373_v13, %v203_v12 }
 0x17a   : > { %v206_v15 = vsub.f32 2.0, %v205_v14 }
 0x17c   : > { %v207_v16 = vmul.f32 %v373_v13, %v206_v15 }
 0x17e   : > { %v210_v18 = vmul.f32 %v207_v16, %v191_v3 }
 0x180   : > { %v217_v20 = vmul.f32 %v318_v17, %v210_v18 }
 0x182   : > { %v224_v21 = vadd.f32 %v319_v19, %v217_v20 }
 0x184   : > { %225 = vst [vmem:[%s185_s10] sm:$0xff] %v224_v21 }
 0x185   : > { %417 = shalt.err (!%p414_p4)
}
 0x186   : > { %s418_s29 = scalar_lea.hbm %s621_s20, 128  ;;  %s422_s7 = scalar_lea.hbm %s668_s3, 256 }
 0x187   : > { %p419_p5 = scmp.ne.s32.totalorder %s621_s20, %s418_s29  ;;  %p423_p0 = scmp.lt.u32.totalorder %s621_s20, %s668_s3 }
 0x188   : > { %p424_p1 = scmp.lt.u32.totalorder %s422_s7, %s418_s29  ;;  %p426_p6 = scmp.lt.u32.totalorder %s418_s29, %s621_s20 }
 0x189   : > { %p420_p8 = pnand %p419_p5, %p677_p11 }
 0x18a   : > { %p425_p3 = por %p424_p1, %p423_p0 }
 0x18b   : > { %p421_p9 = pneg %p420_p8 }
 0x18c   : > { %p427_p12 = por %p426_p6, %p425_p3 }
 0x18e   : > { %p428_p13 = pnand %p427_p12, %p421_p9 }
 0x190   : > { %431 = shalt.err (!%p428_p13)
}
 0x191   : > { %326 = dma.vmem_to_hbm [thread:$0]  (%p677_p11), %s623_s11, 128, %s621_s20, %s227_s22  }
 0x192 PF: > { %s252_s6 = sand.u32 1, %s458_s12   ;;  %p678_p7 = scmp.ne.s32.totalorder %s673_s25, 0 }
 0x193   : > { %p679_p10 = scmp.ge.s32.totalorder %s470_s15, 2  ;;  %s253_s8 = scalar_lea.sflag [#allocation4], %s252_s6 }
 0x195   : > { %p333_p2 = pnand %p679_p10, %p678_p7 }
 0x197   : > { %453 = dma.done.wait (!%p333_p2), %s253_s8, 128  }
 0x198   : > { %455 = vsyncadd (!%p333_p2), %s253_s8, 4294967168  ;;  %p16_p4 = scmp.ge.s32.totalorder %s519_s18, 4   ;;  %s680_s12 = smov %s462_s13 }
 0x199   : > { %s681_s13 = smov %s466_s14  ;;  %s682_s14 = smov %s531_s21 }
 0x19a   : > { %s683_s15 = smov %s519_s18  ;;  %18 = sbr.rel (!%p16_p4) target bundleno = 5 (0x5), region = 77 }
 0x1a1   :  { %258 = vsyncpa [#allocation3], 1 }
 0x1a2   :  { %260 = vsyncpa [#allocation3 + $0x1], 1 }
 0x1a3   :  { %261 = vsyncpa [#allocation4], 1 }
 0x1a4   :  { %263 = vsyncpa [#allocation4 + $0x1], 1 }

</bundles_post_ra>
